<compile_context>
chip_gen: v7x
topology: tpu7x:2x2x1
jax: 0.10.0
libtpu: 0.0.40
codegen_flags: <defaults>
</compile_context>

<pallas_src>
import functools

import jax
import jax.numpy as jnp
from jax import lax
from jax.experimental import pallas as pl
from jax.experimental.pallas import tpu as pltpu

_LANES = 128            # lane width of the flattened entropy view
_MAX_BLOCK_ROWS = 4096  # 4096x128 f32 in + 4096x256 f32 out, double-buffered ~= 12 MiB


def _router_kernel(e_ref, out_ref, *, threshold):
    """Threshold gating with in-kernel lane interleave.

    e_ref   : (BR, 128)  entropy tile
    out_ref : (BR, 256)  interleaved gate tile:
              out[:, 2j] = coarse[:, j], out[:, 2j+1] = fine[:, j]
    """
    e = e_ref[...]
    # Exact torch semantics: both comparisons evaluated (NaN -> both gates 0).
    fine = (e > threshold).astype(jnp.bfloat16)     # gate_fine   in {0, 1}
    coarse = (e <= threshold).astype(jnp.bfloat16)  # gate_coarse in {0, 1}

    # 0/1 scatter matrices: E_even[j, 2j] = 1, E_odd[j, 2j+1] = 1.
    # Built on the VPU every step (cheap, hidden under the HBM store, and
    # megacore-safe: each core materializes its own copy).
    j_ids = lax.broadcasted_iota(jnp.int32, (_LANES, 2 * _LANES), 0)
    l_ids = lax.broadcasted_iota(jnp.int32, (_LANES, 2 * _LANES), 1)
    e_even = (l_ids == 2 * j_ids).astype(jnp.bfloat16)
    e_odd = (l_ids == 2 * j_ids + 1).astype(jnp.bfloat16)

    # Lane interleave on the idle MXU.  All operands are exactly {0, 1} in
    # bf16 and each output column has exactly one contributing product, so the
    # f32-accumulated result is bit-exact.
    out_ref[...] = (
        jnp.dot(coarse, e_even, preferred_element_type=jnp.float32)
        + jnp.dot(fine, e_odd, preferred_element_type=jnp.float32)
    )


def dual_grain_fixed_entropy_gate(entropy, threshold):
    """Compute the (entropy.shape + (2,)) gate with a Pallas TPU kernel."""
    orig_shape = entropy.shape
    n = 1
    for d in orig_shape:
        n *= int(d)

    if n == 0 or n % _LANES != 0:
        # Ragged / tiny maps: a fused XLA elementwise op beats a kernel launch.
        fine = (entropy > threshold).astype(jnp.float32)[..., None]
        coarse = (entropy <= threshold).astype(jnp.float32)[..., None]
        return jnp.concatenate([coarse, fine], axis=-1)

    rows = n // _LANES
    block_rows = rows if rows <= _MAX_BLOCK_ROWS else _MAX_BLOCK_ROWS
    grid = (pl.cdiv(rows, block_rows),)

    e2d = entropy.reshape(rows, _LANES)  # pure view, no data movement

    kernel = functools.partial(_router_kernel, threshold=float(threshold))

    out2d = pl.pallas_call(
        kernel,
        out_shape=jax.ShapeDtypeStruct((rows, 2 * _LANES), jnp.float32),
        grid_spec=pltpu.PrefetchScalarGridSpec(
            num_scalar_prefetch=0,
            grid=grid,
            in_specs=[
                # large lane-dense row tiles of the flattened entropy map
                pl.BlockSpec((block_rows, _LANES), lambda i: (i, 0)),
            ],
            out_specs=pl.BlockSpec((block_rows, 2 * _LANES), lambda i: (i, 0)),
        ),
        compiler_params=pltpu.CompilerParams(
            dimension_semantics=("parallel",),
            vmem_limit_bytes=32 * 1024 * 1024,
        ),
    )(e2d)

    # (rows, 256) row-major has EXACTLY the memory layout of
    # entropy.shape + (2,): flat index r*256 + 2j + g == (element r*128+j, gate g).
    return out2d.reshape(orig_shape + (2,))


class DualGrainFixedEntropyRouter:
    """JAX/Pallas port of the PyTorch DualGrainFixedEntropyRouter."""

    def __init__(self, threshold_table, fine_grain_ratito):
        # TODO(synk): the original module loads the threshold table from a JSON
        # file; here it is a deterministic in-script dict (no file I/O).
        key = str(int(100 - fine_grain_ratito * 100))
        self.fine_grain_threshold = float(threshold_table[key])

    def __call__(self, h_coarse, h_fine, entropy):
        # h_coarse / h_fine (NCHW) are unused by the forward pass, exactly as
        # in the PyTorch module (API parity only).
        del h_coarse, h_fine
        return dual_grain_fixed_entropy_gate(entropy, self.fine_grain_threshold)


if __name__ == "__main__":
    # Deterministic synthetic "json" threshold table (stands in for json_path).
    threshold_table = {str(p): 0.01 * p for p in range(0, 101, 10)}  # "50" -> 0.5
    fine_grain_ratito = 0.5
    router = DualGrainFixedEntropyRouter(threshold_table, fine_grain_ratito)

    key = jax.random.PRNGKey(0)
    k1, k2, k3 = jax.random.split(key, 3)

    B, C, H, W = 2, 4, 16, 16
    h_coarse = jax.random.normal(k1, (B, C, H // 2, W // 2), dtype=jnp.float32)  # NCHW
    h_fine = jax.random.normal(k2, (B, C, H, W), dtype=jnp.float32)              # NCHW
    entropy = jax.random.uniform(k3, (B, H, W), dtype=jnp.float32)
    # Include a NaN to validate exact torch comparison semantics (both gates 0).
    entropy = entropy.at[0, 0, 0].set(jnp.nan)

    gate = router(h_coarse, h_fine, entropy)
    gate = jax.block_until_ready(gate)

    # Reference check (plain JAX) of exact semantics.
    thr = router.fine_grain_threshold
    gate_fine_ref = (entropy > thr).astype(jnp.float32)[..., None]
    gate_coarse_ref = (entropy <= thr).astype(jnp.float32)[..., None]
    gate_ref = jnp.concatenate([gate_coarse_ref, gate_fine_ref], axis=-1)

    assert gate.shape == (B, H, W, 2), gate.shape
    assert gate.dtype == jnp.float32
    assert bool(jnp.all(gate == gate_ref))

    # Ragged-size fallback path (not a multiple of 128 elements).
    entropy_r = jax.random.uniform(jax.random.PRNGKey(1), (1, 5, 7), dtype=jnp.float32)
    gate_r = dual_grain_fixed_entropy_gate(entropy_r, thr)
    gate_r_ref = jnp.concatenate(
        [(entropy_r <= thr).astype(jnp.float32)[..., None],
         (entropy_r > thr).astype(jnp.float32)[..., None]], axis=-1)
    assert bool(jnp.all(jax.block_until_ready(gate_r) == gate_r_ref))

    print("KERNEL_OK")
</pallas_src>

<mosaic_0001>
module attributes {stable_mosaic.version = 11 : i64} {
  func.func @_router_kernel(%arg0: i32, %arg1: memref<4x128xf32, #tpu.memory_space<vmem>>, %arg2: memref<4x256xf32, #tpu.memory_space<vmem>>) attributes {dimension_semantics = [#tpu.dimension_semantics<parallel>], iteration_bounds = array<i64: 1>, scalar_prefetch = 0 : i64, scratch_operands = 0 : i64, tpu.core_type = #tpu.core_type<tc>, window_params = [{transform_indices = @transform_0, window_bounds = array<i64: 4, 128>}, {transform_indices = @transform_1, window_bounds = array<i64: 4, 256>}]} {
    %c0 = arith.constant 0 : index
    %c0_0 = arith.constant 0 : index
    %0 = vector.load %arg1[%c0, %c0_0] : memref<4x128xf32, #tpu.memory_space<vmem>>, vector<4x128xf32>
    %cst = arith.constant 5.000000e-01 : f32
    %1 = vector.broadcast %cst : f32 to vector<4x128xf32>
    %2 = arith.cmpf ogt, %0, %1 : vector<4x128xf32>
    %3 = arith.extui %2 : vector<4x128xi1> to vector<4x128xi32>
    %4 = arith.sitofp %3 : vector<4x128xi32> to vector<4x128xf32>
    %5 = arith.truncf %4 : vector<4x128xf32> to vector<4x128xbf16>
    %cst_1 = arith.constant 5.000000e-01 : f32
    %6 = vector.broadcast %cst_1 : f32 to vector<4x128xf32>
    %7 = arith.cmpf ole, %0, %6 : vector<4x128xf32>
    %8 = arith.extui %7 : vector<4x128xi1> to vector<4x128xi32>
    %9 = arith.sitofp %8 : vector<4x128xi32> to vector<4x128xf32>
    %10 = arith.truncf %9 : vector<4x128xf32> to vector<4x128xbf16>
    %11 = tpu.iota {dimensions = array<i32: 0>} : vector<128x256xi32>
    %12 = tpu.iota {dimensions = array<i32: 1>} : vector<128x256xi32>
    %c2_i32 = arith.constant 2 : i32
    %13 = vector.broadcast %c2_i32 : i32 to vector<128x256xi32>
    %14 = arith.muli %13, %11 : vector<128x256xi32>
    %15 = arith.cmpi eq, %12, %14 : vector<128x256xi32>
    %16 = arith.extui %15 : vector<128x256xi1> to vector<128x256xi32>
    %17 = arith.sitofp %16 : vector<128x256xi32> to vector<128x256xf32>
    %18 = arith.truncf %17 : vector<128x256xf32> to vector<128x256xbf16>
    %c2_i32_2 = arith.constant 2 : i32
    %19 = vector.broadcast %c2_i32_2 : i32 to vector<128x256xi32>
    %20 = arith.muli %19, %11 : vector<128x256xi32>
    %c1_i32 = arith.constant 1 : i32
    %21 = vector.broadcast %c1_i32 : i32 to vector<128x256xi32>
    %22 = arith.addi %20, %21 : vector<128x256xi32>
    %23 = arith.cmpi eq, %12, %22 : vector<128x256xi32>
    %24 = arith.extui %23 : vector<128x256xi1> to vector<128x256xi32>
    %25 = arith.sitofp %24 : vector<128x256xi32> to vector<128x256xf32>
    %26 = arith.truncf %25 : vector<128x256xf32> to vector<128x256xbf16>
    %cst_3 = arith.constant dense<0.000000e+00> : vector<4x256xf32>
    %27 = tpu.matmul %10, %18, %cst_3 {dimension_numbers = #tpu.dot_dimension_numbers<[1], [0], [0], [1], [0, 0, 1, 1], [], []>} : vector<4x128xbf16>, vector<128x256xbf16>, vector<4x256xf32> -> vector<4x256xf32>
    %cst_4 = arith.constant dense<0.000000e+00> : vector<4x256xf32>
    %28 = tpu.matmul %5, %26, %cst_4 {dimension_numbers = #tpu.dot_dimension_numbers<[1], [0], [0], [1], [0, 0, 1, 1], [], []>} : vector<4x128xbf16>, vector<128x256xbf16>, vector<4x256xf32> -> vector<4x256xf32>
    %29 = arith.addf %27, %28 : vector<4x256xf32>
    %c0_5 = arith.constant 0 : index
    %c0_6 = arith.constant 0 : index
    %30 = vector.load %arg2[%c0_5, %c0_6] : memref<4x256xf32, #tpu.memory_space<vmem>>, vector<4x256xf32>
    tpu.vector_store %arg2[%c0_5, %c0_6], %29 {strides = array<i32>} : memref<4x256xf32, #tpu.memory_space<vmem>>, vector<4x256xf32>,
    return
  }
  func.func @transform_0(%arg0: i32) -> (i32, i32) {
    %c0_i32 = arith.constant 0 : i32
    %c0_i32_0 = arith.constant 0 : i32
    return %arg0, %c0_i32 : i32, i32
  }
  func.func @transform_1(%arg0: i32) -> (i32, i32) {
    %c0_i32 = arith.constant 0 : i32
    %c0_i32_0 = arith.constant 0 : i32
    return %arg0, %c0_i32 : i32, i32
  }
}

</mosaic_0001>

<bundles_post_ra>
// kernel: tpu_custom_call.1
= control target key start
LH: loop header
LB: loop body
LE: loop exit
PB: predicated region body
PF: predicated region fallthrough
CT: control target
= control target key end

     0   :  { %6 = vsyncpa [#allocation3], 0  ;;  %s810_s0 = inlined_call_operand.hbm [shape: f32[4,128], index: 0, kind: input, shape index: {}]   ;;  %s811_s1 = inlined_call_operand.hbm [shape: f32[4,256], index: 1, kind: output, shape index: {}]  }
   0x1   :  { %7 = vsyncpa [#allocation4], 0  ;;  %s597_s6 = smov [#allocation2]   ;;  %s549_s10 = scalar_lea.hbm %s810_s0, 64 }
   0x2   :  { %s14_s7 = sshll.u32 %s597_s6, 4  ;;  %p550_p0 = scmp.ne.s32.totalorder %s810_s0, %s549_s10  ;;  %s15_s7 = int_to_ptr.vmem [resolvable:$true] %s14_s7 }
   0x3   :  { %p553_p1 = scmp.lt.u32.totalorder %s549_s10, %s810_s0 }
   0x5   :  { %p555_p2 = pnand %p553_p1, %p550_p0 }
   0x7   :  { %558 = shalt.err (!%p555_p2)
}
   0x8   :  { %s559_s15 = scalar_lea.vmem %s15_s7, 64  ;;  %p564_p4 = scmp.lt.s32.totalorder %s15_s7, %s15_s7 }
   0x9   :  { %p560_p3 = scmp.ne.s32.totalorder %s15_s7, %s559_s15  ;;  %p565_p5 = scmp.lt.s32.totalorder %s559_s15, %s559_s15 }
   0xb   :  { %p566_p6 = por %p565_p5, %p564_p4 }
   0xd   :  { %p567_p7 = pnand %p566_p6, %p560_p3 }
   0xf   :  { %570 = shalt.err (!%p567_p7)
}
  0x10   :  { %17 = dma.hbm_to_vmem [thread:$0]  %s810_s0, 64, %s15_s7, [#allocation3]   ;;  %v31_v0 = vlaneseq }
  0x11   :  { %593 = dma.done.wait [#allocation3], 64  }
  0x12   :  { %594 = vsyncadd [#allocation3], 4294967232  ;;  %v598_v1 = vmov 0   ;;  %v623_v2 = vshrl.u32 %v31_v0, 7  ;;  %v625_v3 = vand.u32 127, %v31_v0  ;;  %s600_s0 = smov [#allocation5]  }
  0x13   :  { %380 = vmatprep.mubr.bf16.mxu0 %v598_v1  ;;  %339 = vmatprep.mubr.bf16.mxu1 %v598_v1  ;;  %v599_v18 = vmov 1.0|1.0   ;;  %v22_v53 = vld [vmem:[#allocation2] sm:$0xf]  ;;  %s400_s18 = sshll.u32 %s600_s0, 4  ;;  %s401_s18 = int_to_ptr.vmem [resolvable:$true] %s400_s18 }
  0x14   :  { %v33_v4 = vadd.s32 8, %v623_v2  ;;  %v629_v5 = vadd.s32 128, %v625_v3  ;;  %v51_v6 = vmul.u32 2, %v623_v2  ;;  %v34_v7 = vadd.s32 16, %v623_v2  ;;  %s571_s19 = scalar_lea.vmem %s401_s18, 128  ;;  %p576_p9 = scmp.lt.s32.totalorder %s401_s18, %s401_s18 }
  0x15   :  { %v35_v8 = vadd.s32 24, %v623_v2  ;;  %v36_v9 = vadd.s32 32, %v623_v2  ;;  %v37_v12 = vadd.s32 40, %v623_v2  ;;  %v38_v15 = vadd.s32 48, %v623_v2  ;;  %p572_p8 = scmp.ne.s32.totalorder %s401_s18, %s571_s19  ;;  %p577_p10 = scmp.lt.s32.totalorder %s571_s19, %s571_s19 }
  0x16   :  { %v52_v10 = vmul.u32 2, %v33_v4  ;;  %vm68_vm0 = vcmp.eq.s32.totalorder %v629_v5, %v51_v6  ;;  %v179_v11 = vadd.s32 1, %v51_v6  ;;  %vm67_vm1 = vcmp.eq.s32.totalorder %v625_v3, %v51_v6 }
  0x17   :  { %v53_v13 = vmul.u32 2, %v34_v7  ;;  %v54_v14 = vmul.u32 2, %v35_v8  ;;  %v39_v17 = vadd.s32 56, %v623_v2  ;;  %v40_v23 = vadd.s32 64, %v623_v2  ;;  %p578_p11 = por %p577_p10, %p576_p9 }
  0x18   :  { %vm70_vm2 = vcmp.eq.s32.totalorder %v629_v5, %v52_v10  ;;  %vm69_vm3 = vcmp.eq.s32.totalorder %v625_v3, %v52_v10  ;;  %v180_v16 = vadd.s32 1, %v52_v10  ;;  %vm196_vm4 = vcmp.eq.s32.totalorder %v629_v5, %v179_v11 }
  0x19   :  { %vm509_vm5 = vmpackc.low %vm70_vm2, %vm68_vm0  ;;  %vm195_vm6 = vcmp.eq.s32.totalorder %v625_v3, %v179_v11  ;;  %vm72_vm7 = vcmp.eq.s32.totalorder %v629_v5, %v53_v13  ;;  %vm74_vm8 = vcmp.eq.s32.totalorder %v629_v5, %v54_v14  ;;  %vm71_vm12 = vcmp.eq.s32.totalorder %v625_v3, %v53_v13  ;;  %p579_p12 = pnand %p578_p11, %p572_p8 }
  0x1a   :  { %510 = vmatprep.subr.msk.bf16.mxu0 %vm509_vm5, %v599_v18  ;;  %vm511_vm9 = vmpackc.low %vm69_vm3, %vm67_vm1  ;;  %vm198_vm10 = vcmp.eq.s32.totalorder %v629_v5, %v180_v16  ;;  %vm197_vm11 = vcmp.eq.s32.totalorder %v625_v3, %v180_v16  ;;  %v181_v19 = vadd.s32 1, %v53_v13  ;;  %vm73_vm14 = vcmp.eq.s32.totalorder %v625_v3, %v54_v14 }
  0x1b   :  { %512 = vmatpush1.bf16.msk.msra.mxu0 %vm511_vm9, %v599_v18  ;;  %vm475_vm13 = vmpackc.low %vm198_vm10, %vm196_vm4  ;;  %v182_v20 = vadd.s32 1, %v54_v14  ;;  %v55_v21 = vmul.u32 2, %v36_v9  ;;  %v56_v22 = vmul.u32 2, %v37_v12  ;;  %v41_v24 = vadd.s32 72, %v623_v2 }
  0x1c   :  { %476 = vmatprep.subr.msk.bf16.mxu1 %vm475_vm13, %v599_v18  ;;  %vm477_vm15 = vmpackc.low %vm197_vm11, %vm195_vm6  ;;  %vm200_vm0 = vcmp.eq.s32.totalorder %v629_v5, %v181_v19  ;;  %vm199_vm1 = vcmp.eq.s32.totalorder %v625_v3, %v181_v19  ;;  %v57_v25 = vmul.u32 2, %v38_v15  ;;  %v58_v26 = vmul.u32 2, %v39_v17 }
  0x1d   :  { %478 = vmatpush1.bf16.msk.msra.mxu1 %vm477_vm15, %v599_v18  ;;  %vm513_vm2 = vmpackc.low %vm74_vm8, %vm72_vm7  ;;  %vm202_vm3 = vcmp.eq.s32.totalorder %v629_v5, %v182_v20  ;;  %vm201_vm4 = vcmp.eq.s32.totalorder %v625_v3, %v182_v20  ;;  %vm76_vm6 = vcmp.eq.s32.totalorder %v629_v5, %v55_v21  ;;  %vm78_vm9 = vcmp.eq.s32.totalorder %v629_v5, %v56_v22 }
  0x1e   :  { %514 = vmatprep.subr.msk.bf16.mxu0 %vm513_vm2, %v599_v18  ;;  %vm515_vm5 = vmpackc.low %vm73_vm14, %vm71_vm12  ;;  %v183_v27 = vadd.s32 1, %v55_v21  ;;  %v184_v28 = vadd.s32 1, %v56_v22  ;;  %vm75_vm8 = vcmp.eq.s32.totalorder %v625_v3, %v55_v21  ;;  %vm77_vm10 = vcmp.eq.s32.totalorder %v625_v3, %v56_v22 }
  0x1f   :  { %516 = vmatpush1.bf16.msk.msra.mxu0 %vm515_vm5, %v599_v18  ;;  %vm479_vm7 = vmpackc.low %vm202_vm3, %vm200_vm0  ;;  %v185_v29 = vadd.s32 1, %v57_v25  ;;  %v186_v30 = vadd.s32 1, %v58_v26  ;;  %v59_v31 = vmul.u32 2, %v40_v23  ;;  %v60_v32 = vmul.u32 2, %v41_v24 }
  0x20   :  { %480 = vmatprep.subr.msk.bf16.mxu1 %vm479_vm7, %v599_v18  ;;  %vm481_vm11 = vmpackc.low %vm201_vm4, %vm199_vm1  ;;  %vm204_vm12 = vcmp.eq.s32.totalorder %v629_v5, %v183_v27  ;;  %vm206_vm13 = vcmp.eq.s32.totalorder %v629_v5, %v184_v28  ;;  %vm203_vm14 = vcmp.eq.s32.totalorder %v625_v3, %v183_v27  ;;  %vm205_vm15 = vcmp.eq.s32.totalorder %v625_v3, %v184_v28 }
  0x21   :  { %482 = vmatpush1.bf16.msk.msra.mxu1 %vm481_vm11, %v599_v18  ;;  %vm517_vm0 = vmpackc.low %vm78_vm9, %vm76_vm6  ;;  %vm80_vm2 = vcmp.eq.s32.totalorder %v629_v5, %v57_v25  ;;  %vm82_vm3 = vcmp.eq.s32.totalorder %v629_v5, %v58_v26  ;;  %v42_v33 = vadd.s32 80, %v623_v2  ;;  %v43_v34 = vadd.s32 88, %v623_v2 }
  0x22   :  { %518 = vmatprep.subr.msk.bf16.mxu0 %vm517_vm0, %v599_v18  ;;  %vm519_vm1 = vmpackc.low %vm77_vm10, %vm75_vm8  ;;  %vm79_vm5 = vcmp.eq.s32.totalorder %v625_v3, %v57_v25  ;;  %vm81_vm6 = vcmp.eq.s32.totalorder %v625_v3, %v58_v26  ;;  %v44_v35 = vadd.s32 96, %v623_v2  ;;  %v45_v36 = vadd.s32 104, %v623_v2 }
  0x23   :  { %520 = vmatpush1.bf16.msk.msra.mxu0 %vm519_vm1, %v599_v18  ;;  %vm483_vm4 = vmpackc.low %vm206_vm13, %vm204_vm12  ;;  %vm208_vm7 = vcmp.eq.s32.totalorder %v629_v5, %v185_v29  ;;  %vm210_vm8 = vcmp.eq.s32.totalorder %v629_v5, %v186_v30  ;;  %vm207_vm10 = vcmp.eq.s32.totalorder %v625_v3, %v185_v29  ;;  %vm209_vm11 = vcmp.eq.s32.totalorder %v625_v3, %v186_v30 }
  0x24   :  { %484 = vmatprep.subr.msk.bf16.mxu1 %vm483_vm4, %v599_v18  ;;  %vm485_vm9 = vmpackc.low %vm205_vm15, %vm203_vm14  ;;  %v187_v37 = vadd.s32 1, %v59_v31  ;;  %v188_v38 = vadd.s32 1, %v60_v32  ;;  %v61_v39 = vmul.u32 2, %v42_v33  ;;  %v62_v40 = vmul.u32 2, %v43_v34 }
  0x25   :  { %486 = vmatpush1.bf16.msk.msra.mxu1 %vm485_vm9, %v599_v18  ;;  %vm521_vm12 = vmpackc.low %vm82_vm3, %vm80_vm2  ;;  %vm84_vm14 = vcmp.eq.s32.totalorder %v629_v5, %v59_v31  ;;  %vm86_vm15 = vcmp.eq.s32.totalorder %v629_v5, %v60_v32  ;;  %vm83_vm1 = vcmp.eq.s32.totalorder %v625_v3, %v59_v31  ;;  %vm85_vm2 = vcmp.eq.s32.totalorder %v625_v3, %v60_v32 }
  0x26   :  { %522 = vmatprep.subr.msk.bf16.mxu0 %vm521_vm12, %v599_v18  ;;  %vm523_vm13 = vmpackc.low %vm81_vm6, %vm79_vm5  ;;  %v63_v41 = vmul.u32 2, %v44_v35  ;;  %v64_v42 = vmul.u32 2, %v45_v36  ;;  %vm212_vm4 = vcmp.eq.s32.totalorder %v629_v5, %v187_v37  ;;  %vm214_vm5 = vcmp.eq.s32.totalorder %v629_v5, %v188_v38 }
  0x27   :  { %524 = vmatpush1.bf16.msk.msra.mxu0 %vm523_vm13, %v599_v18  ;;  %vm487_vm0 = vmpackc.low %vm210_vm8, %vm208_vm7  ;;  %v46_v43 = vadd.s32 112, %v623_v2  ;;  %v47_v44 = vadd.s32 120, %v623_v2  ;;  %vm211_vm9 = vcmp.eq.s32.totalorder %v625_v3, %v187_v37  ;;  %vm213_vm7 = vcmp.eq.s32.totalorder %v625_v3, %v188_v38 }
  0x28   :  { %488 = vmatprep.subr.msk.bf16.mxu1 %vm487_vm0, %v599_v18  ;;  %vm489_vm3 = vmpackc.low %vm209_vm11, %vm207_vm10  ;;  %v189_v45 = vadd.s32 1, %v61_v39  ;;  %v190_v46 = vadd.s32 1, %v62_v40  ;;  %vm88_vm10 = vcmp.eq.s32.totalorder %v629_v5, %v61_v39  ;;  %vm90_vm11 = vcmp.eq.s32.totalorder %v629_v5, %v62_v40 }
  0x29   :  { %490 = vmatpush1.bf16.msk.msra.mxu1 %vm489_vm3, %v599_v18  ;;  %vm525_vm6 = vmpackc.low %vm86_vm15, %vm84_vm14  ;;  %vm87_vm13 = vcmp.eq.s32.totalorder %v625_v3, %v61_v39  ;;  %vm89_vm14 = vcmp.eq.s32.totalorder %v625_v3, %v62_v40  ;;  %v191_v47 = vadd.s32 1, %v63_v41  ;;  %v192_v48 = vadd.s32 1, %v64_v42 }
  0x2a   :  { %526 = vmatprep.subr.msk.bf16.mxu0 %vm525_vm6, %v599_v18  ;;  %vm527_vm8 = vmpackc.low %vm85_vm2, %vm83_vm1  ;;  %vm216_vm0 = vcmp.eq.s32.totalorder %v629_v5, %v189_v45  ;;  %vm218_vm1 = vcmp.eq.s32.totalorder %v629_v5, %v190_v46  ;;  %vm215_vm3 = vcmp.eq.s32.totalorder %v625_v3, %v189_v45  ;;  %v65_v49 = vmul.u32 2, %v46_v43 }
  0x2b   :  { %528 = vmatpush1.bf16.msk.msra.mxu0 %vm527_vm8, %v599_v18  ;;  %vm491_vm12 = vmpackc.low %vm214_vm5, %vm212_vm4  ;;  %vm217_vm4 = vcmp.eq.s32.totalorder %v625_v3, %v190_v46  ;;  %v66_v50 = vmul.u32 2, %v47_v44  ;;  %vm92_vm6 = vcmp.eq.s32.totalorder %v629_v5, %v63_v41  ;;  %vm91_vm8 = vcmp.eq.s32.totalorder %v625_v3, %v63_v41 }
  0x2c   :  { %492 = vmatprep.subr.msk.bf16.mxu1 %vm491_vm12, %v599_v18  ;;  %vm493_vm15 = vmpackc.low %vm213_vm7, %vm211_vm9  ;;  %vm94_vm9 = vcmp.eq.s32.totalorder %v629_v5, %v64_v42  ;;  %vm220_vm12 = vcmp.eq.s32.totalorder %v629_v5, %v191_v47  ;;  %v193_v51 = vadd.s32 1, %v65_v49 }
  0x2d   :  { %494 = vmatpush1.bf16.msk.msra.mxu1 %vm493_vm15, %v599_v18  ;;  %vm529_vm2 = vmpackc.low %vm90_vm11, %vm88_vm10  ;;  %vm93_vm10 = vcmp.eq.s32.totalorder %v625_v3, %v64_v42  ;;  %v194_v52 = vadd.s32 1, %v66_v50  ;;  %vm219_vm15 = vcmp.eq.s32.totalorder %v625_v3, %v191_v47 }
  0x2e   :  { %530 = vmatprep.subr.msk.bf16.mxu0 %vm529_vm2, %v599_v18  ;;  %vm531_vm5 = vmpackc.low %vm89_vm14, %vm87_vm13  ;;  %vm222_vm13 = vcmp.eq.s32.totalorder %v629_v5, %v192_v48  ;;  %vm96_vm2 = vcmp.eq.s32.totalorder %v629_v5, %v65_v49 }
  0x2f   :  { %532 = vmatpush1.bf16.msk.msra.mxu0 %vm531_vm5, %v599_v18  ;;  %vm495_vm7 = vmpackc.low %vm218_vm1, %vm216_vm0  ;;  %vm221_vm0 = vcmp.eq.s32.totalorder %v625_v3, %v192_v48  ;;  %vm95_vm5 = vcmp.eq.s32.totalorder %v625_v3, %v65_v49 }
  0x30   :  { %496 = vmatprep.subr.msk.bf16.mxu1 %vm495_vm7, %v599_v18  ;;  %vm497_vm11 = vmpackc.low %vm217_vm4, %vm215_vm3  ;;  %vm98_vm3 = vcmp.eq.s32.totalorder %v629_v5, %v66_v50  ;;  %vm97_vm7 = vcmp.eq.s32.totalorder %v625_v3, %v66_v50 }
  0x31   :  { %498 = vmatpush1.bf16.msk.msra.mxu1 %vm497_vm11, %v599_v18  ;;  %vm533_vm14 = vmpackc.low %vm94_vm9, %vm92_vm6  ;;  %vm224_vm9 = vcmp.eq.s32.totalorder %v629_v5, %v193_v51  ;;  %vm226_vm11 = vcmp.eq.s32.totalorder %v629_v5, %v194_v52 }
  0x32   :  { %534 = vmatprep.subr.msk.bf16.mxu0 %vm533_vm14, %v599_v18  ;;  %vm535_vm1 = vmpackc.low %vm93_vm10, %vm91_vm8  ;;  %vm223_vm10 = vcmp.eq.s32.totalorder %v625_v3, %v193_v51  ;;  %vm225_vm14 = vcmp.eq.s32.totalorder %v625_v3, %v194_v52 }
  0x33   :  { %536 = vmatpush1.bf16.msk.msra.mxu0 %vm535_vm1, %v599_v18  ;;  %vm499_vm4 = vmpackc.low %vm222_vm13, %vm220_vm12  ;;  %vm27_vm13 = vcmp.le.f32.partialorder %v22_v53, 0.5 }
  0x34   :  { %500 = vmatprep.subr.msk.bf16.mxu1 %vm499_vm4, %v599_v18  ;;  %vm501_vm6 = vmpackc.low %vm221_vm0, %vm219_vm15  ;;  %vm23_vm4 = vcmp.gt.f32.partialorder %v22_v53, 0.5 }
  0x35   :  { %502 = vmatpush1.bf16.msk.msra.mxu1 %vm501_vm6, %v599_v18  ;;  %vm537_vm8 = vmpackc.low %vm98_vm3, %vm96_vm2 }
  0x36   :  { %538 = vmatprep.subr.msk.bf16.mxu0 %vm537_vm8, %v599_v18  ;;  %vm539_vm12 = vmpackc.low %vm97_vm7, %vm95_vm5 }
  0x37   :  { %540 = vmatpush1.bf16.msk.msra.mxu0 %vm539_vm12, %v599_v18  ;;  %vm503_vm1 = vmpackc.low %vm226_vm11, %vm224_vm9 }
  0x38   :  { %504 = vmatprep.subr.msk.bf16.mxu1 %vm503_vm1, %v599_v18  ;;  %vm505_vm15 = vmpackc.low %vm225_vm14, %vm223_vm10 }
  0x39   :  { %506 = vmatpush1.bf16.msk.msra.mxu1 %vm505_vm15, %v599_v18  ;;  %vm541_vm0 = vmpackc.low %vm27_vm13, %vm27_vm13 }
  0x3a   :  { %542 = vmatmul.mubr.msk.bf16.vlgmr.msra.gmra.mrb[0].mxu0 %vm541_vm0, %v599_v18  ;;  %vm507_vm2 = vmpackc.low %vm23_vm4, %vm23_vm4 }
  0x3c   :  { %508 = vmatmul.mubr.msk.bf16.vlgmr.msra.gmra.mrb[0].mxu1 %vm507_vm2, %v599_v18 }
 0x10d   :  { %v382_v54 = vpop.f32.mrb[0].mxu0 }
 0x10e   :  { %v384_v55 = vpop.f32.mrb[1].mxu0 }
 0x10f   :  { %v341_v56 = vpop.f32.mrb[0].mxu1  ;;  %v386_v57 = vpop.f32.mrb[2].mxu0 }
 0x110   :  { %v383_v58 = vadd.f32 %v382_v54, %v341_v56  ;;  %v343_v59 = vpop.f32.mrb[1].mxu1  ;;  %v387_v60 = vpop.f32.mrb[3].mxu0 }
 0x111   :  { %v385_v61 = vadd.f32 %v384_v55, %v343_v59  ;;  %v345_v62 = vpop.f32.mrb[2].mxu1 }
 0x112   :  { %v346_v63 = vpop.f32.mrb[3].mxu1 }
 0x113   :  { %v391_v0 = vcombine.low %v383_v58, %v385_v61 }
 0x115   :  { %393 = vst [vmem:[#allocation5] sm:$0xff] %v391_v0 }
 0x116   :  { %582 = shalt.err (!%p579_p12)
}
 0x117   :  { %s583_s22 = scalar_lea.hbm %s811_s1, 128 }
 0x118   :  { %p584_p13 = scmp.ne.s32.totalorder %s811_s1, %s583_s22  ;;  %p587_p0 = scmp.lt.u32.totalorder %s583_s22, %s811_s1 }
 0x11a   :  { %p589_p1 = pnand %p587_p0, %p584_p13 }
 0x11c   :  { %592 = shalt.err (!%p589_p1)
}
 0x11d   :  { %403 = dma.vmem_to_hbm [thread:$0]  %s401_s18, 128, %s811_s1, [#allocation4]  }
 0x11e   :  { %595 = dma.done.wait [#allocation4], 128  }
 0x11f   :  { %596 = vsyncadd [#allocation4], 4294967168 }
 0x120   :  { %407 = vsyncpa [#allocation3], 1 }
 0x121   :  { %408 = vsyncpa [#allocation4], 1 }

</bundles_post_ra>
